<compile_context>
chip_gen: v7x
topology: tpu7x:2x2x1
jax: 0.10.0
libtpu: 0.0.40
codegen_flags: <defaults>
</compile_context>

<pallas_src>
import functools

import jax
import jax.numpy as jnp
from jax.experimental import pallas as pl
from jax.experimental.pallas import tpu as pltpu

_LANE = 128


def _round_up(v, m):
    return ((v + m - 1) // m) * m


def _vmem_budget_bytes():
    """Per-TensorCore VMEM budget, generation-aware with a conservative fallback."""
    try:
        cap = int(pltpu.get_tpu_info().vmem_capacity_bytes)  # 128 MiB v5e/v6e, 64 MiB v7x
    except Exception:
        cap = 64 * 1024 * 1024                               # assume the smallest (v7x)
    return max(8 * 1024 * 1024, int(cap * 0.75))             # headroom for Mosaic internals


def _pick_spatial_tile(lp, n_batch, kd, oc, in_bytes, out_bytes, budget):
    """Largest 128-aligned divisor of `lp` whose working set fits `budget`,
    capped so the (batch, tile) grid has >= 2 steps (v7x megacore)."""

    def fits(tl):
        need = (2 * kd * tl * in_bytes        # patches tile (double-buffered)
                + 2 * oc * tl * out_bytes     # output tile  (double-buffered)
                + oc * kd * in_bytes          # resident weight (single-buffered)
                + oc * 4)                     # resident bias
        return need <= budget

    tile = _LANE
    for cand in range(lp, _LANE - 1, -_LANE):
        if lp % cand == 0 and fits(cand):
            tile = cand
            break
    # v7x shards "parallel" grid axes over its 2 TensorCores: make sure the
    # grid has at least 2 steps whenever the problem is big enough to split.
    if n_batch * (lp // tile) < 2 and lp // _LANE >= 2:
        half = (lp // 2) // _LANE * _LANE
        for cand in range(half, _LANE - 1, -_LANE):
            if lp % cand == 0:
                tile = cand
                break
    return tile


def _resident_spec(block_shape, index_map):
    """BlockSpec for grid-invariant operands: single-buffered when supported."""
    try:
        return pl.BlockSpec(block_shape, index_map, pipeline_mode=pl.Buffered(1))
    except (AttributeError, TypeError):
        return pl.BlockSpec(block_shape, index_map)


def _group_conv_kernel(w_ref, p_ref, b_ref, o_ref):
    # w_ref: [OC, Kd]   bf16 block-diagonal group-fused weight (grid-resident)
    # p_ref: [Kd, TL]   bf16 im2col patches; spatial tile on the 128-lane axis
    # b_ref: [OC, 1]    f32 bias (grid-resident)
    # o_ref: [1, OC, TL]
    acc = jnp.dot(w_ref[...], p_ref[...], preferred_element_type=jnp.float32)
    o_ref[0] = (acc + b_ref[...]).astype(o_ref.dtype)


def grouped_conv2d_pallas(x, weight, bias, *, groups, stride, padding,
                          single_buffer_resident=True):
    """Forward of MyGroup: grouped conv2d, NCHW in / NCHW out."""
    N, C, H, W = x.shape
    OC, ICg, KH, KW = weight.shape
    G = groups
    assert C == G * ICg and OC % G == 0
    OCg = OC // G
    SH, SW = stride
    PH, PW = padding
    OH = (H + 2 * PH - KH) // SH + 1
    OW = (W + 2 * PW - KW) // SW + 1
    L = OH * OW
    Lp = _round_up(L, _LANE)         # lane-aligned columns (pad sliced off later)
    Kd = C * KH * KW

    # --- im2col on the XLA side (strided slicing never hits Mosaic) ----------
    # TODO(synk): for large C, fold im2col into the kernel (halo DMA from a
    # memory_space=pl.ANY input + KH*KW accumulated dots) to remove the ~KH*KW x
    # HBM inflation of the materialized patch matrix.
    xp = jnp.pad(x, ((0, 0), (0, 0), (PH, PH), (PW, PW)))       # [N, C, Hp, Wp]
    xp = xp.transpose(1, 0, 2, 3)                               # [C, N, Hp, Wp]
    taps = []
    for kh in range(KH):                                        # small static loops
        for kw in range(KW):
            taps.append(jax.lax.slice(
                xp,
                (0, 0, kh, kw),
                (C, N, kh + (OH - 1) * SH + 1, kw + (OW - 1) * SW + 1),
                (1, 1, SH, SW)))                                # [C, N, OH, OW]
    patches = jnp.stack(taps, axis=1).reshape(Kd, N, L)         # rows (c, kh, kw)
    if Lp != L:
        patches = jnp.pad(patches, ((0, 0), (0, 0), (0, Lp - L)))
    patches = patches.reshape(Kd, N * Lp).astype(jnp.bfloat16)  # cols (n, oh*ow)

    # --- block-diagonal weight: fuses all G groups into one MXU contraction --
    # TODO(synk): once ICg*KH*KW exceeds one MXU pass (~128/256 deep), switch to
    # a group grid axis (per-group weight/patch blocks) instead of zero-padding.
    w_bd = jnp.zeros((OC, C, KH, KW), weight.dtype)
    for g in range(G):
        w_bd = jax.lax.dynamic_update_slice(
            w_bd, weight[g * OCg:(g + 1) * OCg], (g * OCg, g * ICg, 0, 0))
    w_bd = w_bd.reshape(OC, Kd).astype(jnp.bfloat16)
    b2d = bias.astype(jnp.float32).reshape(OC, 1)

    budget = _vmem_budget_bytes()
    TL = _pick_spatial_tile(Lp, N, Kd, OC, in_bytes=2,
                            out_bytes=x.dtype.itemsize, budget=budget)
    tiles_per_sample = Lp // TL
    grid = (N, tiles_per_sample)

    if single_buffer_resident:
        w_spec = _resident_spec((OC, Kd), lambda n, t: (0, 0))
        b_spec = _resident_spec((OC, 1), lambda n, t: (0, 0))
    else:
        w_spec = pl.BlockSpec((OC, Kd), lambda n, t: (0, 0))
        b_spec = pl.BlockSpec((OC, 1), lambda n, t: (0, 0))

    out3d = pl.pallas_call(
        _group_conv_kernel,
        out_shape=jax.ShapeDtypeStruct((N, OC, Lp), x.dtype),
        grid=grid,
        in_specs=[
            w_spec,                                                   # resident weight
            pl.BlockSpec((Kd, TL),
                         lambda n, t: (0, n * tiles_per_sample + t)), # patches tile
            b_spec,                                                   # resident bias
        ],
        out_specs=pl.BlockSpec((1, OC, TL), lambda n, t: (n, 0, t)),  # lane-dense out
        compiler_params=pltpu.CompilerParams(
            dimension_semantics=("parallel", "parallel"),
            vmem_limit_bytes=budget),
    )(w_bd, patches, b2d)

    if Lp != L:
        out3d = out3d[:, :, :L]
    return out3d.reshape(N, OC, OH, OW)   # free reshape: no trailing transpose


if __name__ == "__main__":
    # Mirrors nn.Conv2d(in_ch, out_ch, k, stride, padding, groups=G, bias=True)
    # that MyGroup decomposes into per-group convs.
    N, IN_CH, OUT_CH, GROUPS = 2, 8, 8, 2
    H = W = 16
    KH = KW = 3
    STRIDE = (1, 1)
    PADDING = (1, 1)

    key = jax.random.PRNGKey(0)
    kx, kw_, kb = jax.random.split(key, 3)
    x = jax.random.normal(kx, (N, IN_CH, H, W), jnp.float32)
    weight = jax.random.normal(
        kw_, (OUT_CH, IN_CH // GROUPS, KH, KW), jnp.float32) * 0.1
    bias = jax.random.normal(kb, (OUT_CH,), jnp.float32) * 0.1

    def run(single_buffer_resident):
        fwd = jax.jit(functools.partial(
            grouped_conv2d_pallas, groups=GROUPS, stride=STRIDE,
            padding=PADDING, single_buffer_resident=single_buffer_resident))
        return jax.block_until_ready(fwd(x, weight, bias))

    try:
        out = run(True)
    except Exception:
        # Graceful fallback if this jax build rejects Buffered(1) resident specs.
        out = run(False)

    # Sanity check vs XLA's grouped conv (same semantics as the PyTorch module:
    # chunk -> per-group conv -> concat).
    ref = jax.lax.conv_general_dilated(
        x, weight, window_strides=STRIDE,
        padding=[(PADDING[0], PADDING[0]), (PADDING[1], PADDING[1])],
        dimension_numbers=("NCHW", "OIHW", "NCHW"),
        feature_group_count=GROUPS,
    ) + bias[None, :, None, None]

    assert out.shape == ref.shape, (out.shape, ref.shape)
    # bf16 MXU inputs (f32 accumulation): tolerance loosened vs the f32 path.
    max_err = float(jnp.max(jnp.abs(out - ref)))
    assert jnp.allclose(out, ref, atol=5e-2, rtol=5e-2), max_err

    print("KERNEL_OK")
</pallas_src>

<mosaic_0001>
module attributes {stable_mosaic.version = 11 : i64} {
  func.func @_group_conv_kernel(%arg0: i32, %arg1: i32, %arg2: memref<8x72xbf16, #tpu.memory_space<vmem>>, %arg3: memref<72x256xbf16, #tpu.memory_space<vmem>>, %arg4: memref<8x1xf32, #tpu.memory_space<vmem>>, %arg5: memref<1x8x256xf32, #tpu.memory_space<vmem>>) attributes {dimension_semantics = [#tpu.dimension_semantics<parallel>, #tpu.dimension_semantics<parallel>], iteration_bounds = array<i64: 2, 1>, scalar_prefetch = 0 : i64, scratch_operands = 0 : i64, tpu.core_type = #tpu.core_type<tc>, window_params = [{pipeline_mode = #tpu.pipeline_mode<synchronous>, transform_indices = @transform_0, window_bounds = array<i64: 8, 72>}, {transform_indices = @transform_1, window_bounds = array<i64: 72, 256>}, {pipeline_mode = #tpu.pipeline_mode<synchronous>, transform_indices = @transform_2, window_bounds = array<i64: 8, 1>}, {transform_indices = @transform_3, window_bounds = array<i64: 1, 8, 256>}]} {
    %c0 = arith.constant 0 : index
    %c0_0 = arith.constant 0 : index
    %0 = vector.load %arg2[%c0, %c0_0] : memref<8x72xbf16, #tpu.memory_space<vmem>>, vector<8x72xbf16>
    %c0_1 = arith.constant 0 : index
    %c0_2 = arith.constant 0 : index
    %1 = vector.load %arg3[%c0_1, %c0_2] : memref<72x256xbf16, #tpu.memory_space<vmem>>, vector<72x256xbf16>
    %cst = arith.constant dense<0.000000e+00> : vector<8x256xf32>
    %2 = tpu.matmul %0, %1, %cst {dimension_numbers = #tpu.dot_dimension_numbers<[1], [0], [0], [1], [0, 0, 1, 1], [], []>} : vector<8x72xbf16>, vector<72x256xbf16>, vector<8x256xf32> -> vector<8x256xf32>
    %c0_3 = arith.constant 0 : index
    %c0_4 = arith.constant 0 : index
    %3 = vector.load %arg4[%c0_3, %c0_4] : memref<8x1xf32, #tpu.memory_space<vmem>>, vector<8x1xf32>
    %4 = vector.broadcast %3 : vector<8x1xf32> to vector<8x256xf32>
    %5 = arith.addf %2, %4 : vector<8x256xf32>
    %c0_5 = arith.constant 0 : index
    %c0_6 = arith.constant 0 : index
    %c0_7 = arith.constant 0 : index
    %6 = vector.load %arg5[%c0_5, %c0_6, %c0_7] : memref<1x8x256xf32, #tpu.memory_space<vmem>>, vector<1x8x256xf32>
    %7 = vector.shape_cast %6 : vector<1x8x256xf32> to vector<8x256xf32>
    %8 = vector.shape_cast %5 : vector<8x256xf32> to vector<1x8x256xf32>
    tpu.vector_store %arg5[%c0_5, %c0_6, %c0_7], %8 {strides = array<i32>} : memref<1x8x256xf32, #tpu.memory_space<vmem>>, vector<1x8x256xf32>,
    return
  }
  func.func @transform_0(%arg0: i32, %arg1: i32) -> (i32, i32) {
    %c0_i32 = arith.constant 0 : i32
    %c0_i32_0 = arith.constant 0 : i32
    %c0_i32_1 = arith.constant 0 : i32
    return %c0_i32, %c0_i32_0 : i32, i32
  }
  func.func @transform_1(%arg0: i32, %arg1: i32) -> (i32, i32) {
    %c1_i32 = arith.constant 1 : i32
    %0 = arith.muli %arg0, %c1_i32 : i32
    %1 = arith.addi %0, %arg1 : i32
    %c0_i32 = arith.constant 0 : i32
    %c0_i32_0 = arith.constant 0 : i32
    return %c0_i32, %1 : i32, i32
  }
  func.func @transform_2(%arg0: i32, %arg1: i32) -> (i32, i32) {
    %c0_i32 = arith.constant 0 : i32
    %c0_i32_0 = arith.constant 0 : i32
    %c0_i32_1 = arith.constant 0 : i32
    return %c0_i32, %c0_i32_0 : i32, i32
  }
  func.func @transform_3(%arg0: i32, %arg1: i32) -> (i32, i32, i32) {
    %c0_i32 = arith.constant 0 : i32
    %c0_i32_0 = arith.constant 0 : i32
    return %arg0, %c0_i32, %arg1 : i32, i32, i32
  }
}

module attributes {stable_mosaic.version = 11 : i64} {
  func.func @_group_conv_kernel(%arg0: i32, %arg1: i32, %arg2: memref<8x72xbf16, #tpu.memory_space<vmem>>, %arg3: memref<72x256xbf16, #tpu.memory_space<vmem>>, %arg4: memref<8x1xf32, #tpu.memory_space<vmem>>, %arg5: memref<1x8x256xf32, #tpu.memory_space<vmem>>) attributes {dimension_semantics = [#tpu.dimension_semantics<parallel>, #tpu.dimension_semantics<parallel>], iteration_bounds = array<i64: 2, 1>, scalar_prefetch = 0 : i64, scratch_operands = 0 : i64, tpu.core_type = #tpu.core_type<tc>, window_params = [{pipeline_mode = #tpu.pipeline_mode<synchronous>, transform_indices = @transform_0, window_bounds = array<i64: 8, 72>}, {transform_indices = @transform_1, window_bounds = array<i64: 72, 256>}, {pipeline_mode = #tpu.pipeline_mode<synchronous>, transform_indices = @transform_2, window_bounds = array<i64: 8, 1>}, {transform_indices = @transform_3, window_bounds = array<i64: 1, 8, 256>}]} {
    %c0 = arith.constant 0 : index
    %c0_0 = arith.constant 0 : index
    %0 = vector.load %arg2[%c0, %c0_0] : memref<8x72xbf16, #tpu.memory_space<vmem>>, vector<8x72xbf16>
    %c0_1 = arith.constant 0 : index
    %c0_2 = arith.constant 0 : index
    %1 = vector.load %arg3[%c0_1, %c0_2] : memref<72x256xbf16, #tpu.memory_space<vmem>>, vector<72x256xbf16>
    %cst = arith.constant dense<0.000000e+00> : vector<8x256xf32>
    %2 = tpu.matmul %0, %1, %cst {dimension_numbers = #tpu.dot_dimension_numbers<[1], [0], [0], [1], [0, 0, 1, 1], [], []>} : vector<8x72xbf16>, vector<72x256xbf16>, vector<8x256xf32> -> vector<8x256xf32>
    %c0_3 = arith.constant 0 : index
    %c0_4 = arith.constant 0 : index
    %3 = vector.load %arg4[%c0_3, %c0_4] : memref<8x1xf32, #tpu.memory_space<vmem>>, vector<8x1xf32>
    %4 = vector.broadcast %3 : vector<8x1xf32> to vector<8x256xf32>
    %5 = arith.addf %2, %4 : vector<8x256xf32>
    %c0_5 = arith.constant 0 : index
    %c0_6 = arith.constant 0 : index
    %c0_7 = arith.constant 0 : index
    %6 = vector.load %arg5[%c0_5, %c0_6, %c0_7] : memref<1x8x256xf32, #tpu.memory_space<vmem>>, vector<1x8x256xf32>
    %7 = vector.shape_cast %6 : vector<1x8x256xf32> to vector<8x256xf32>
    %8 = vector.shape_cast %5 : vector<8x256xf32> to vector<1x8x256xf32>
    tpu.vector_store %arg5[%c0_5, %c0_6, %c0_7], %8 {strides = array<i32>} : memref<1x8x256xf32, #tpu.memory_space<vmem>>, vector<1x8x256xf32>,
    return
  }
  func.func @transform_0(%arg0: i32, %arg1: i32) -> (i32, i32) {
    %c0_i32 = arith.constant 0 : i32
    %c0_i32_0 = arith.constant 0 : i32
    %c0_i32_1 = arith.constant 0 : i32
    return %c0_i32, %c0_i32_0 : i32, i32
  }
  func.func @transform_1(%arg0: i32, %arg1: i32) -> (i32, i32) {
    %c1_i32 = arith.constant 1 : i32
    %0 = arith.muli %arg0, %c1_i32 : i32
    %1 = arith.addi %0, %arg1 : i32
    %c0_i32 = arith.constant 0 : i32
    %c0_i32_0 = arith.constant 0 : i32
    return %c0_i32, %1 : i32, i32
  }
  func.func @transform_2(%arg0: i32, %arg1: i32) -> (i32, i32) {
    %c0_i32 = arith.constant 0 : i32
    %c0_i32_0 = arith.constant 0 : i32
    %c0_i32_1 = arith.constant 0 : i32
    return %c0_i32, %c0_i32_0 : i32, i32
  }
  func.func @transform_3(%arg0: i32, %arg1: i32) -> (i32, i32, i32) {
    %c0_i32 = arith.constant 0 : i32
    %c0_i32_0 = arith.constant 0 : i32
    return %arg0, %c0_i32, %arg1 : i32, i32, i32
  }
}

</mosaic_0001>

<bundles_post_ra>
// kernel: grouped_conv2d_pallas.1
= control target key start
LH: loop header
LB: loop body
LE: loop exit
PB: predicated region body
PF: predicated region fallthrough
CT: control target
= control target key end

     0   :  { %s614_s12 = smov 0   ;;  %s616_s13 = smov 0   ;;  %s686_s0 = inlined_call_operand.vmem [shape: bf16[8,72], index: 0, kind: input, shape index: {}]   ;;  %s687_s1 = inlined_call_operand.vmem [shape: bf16[72,512], index: 1, kind: input, shape index: {}]   ;;  %s688_s2 = inlined_call_operand.vmem [shape: f32[8,1], index: 2, kind: input, shape index: {}]   ;;  %s689_s3 = inlined_call_operand.vmem [shape: f32[2,8,256], index: 3, kind: output, shape index: {}]  }
   0x1   :  { %s618_s14 = smov 0   ;;  %s620_s15 = smov 0  }
   0x2   :  { %s622_s16 = smov 0  }
   0x3 LB: > { %s25_s17 = sadd.s32 1, %s587_s15  ;;  %p62_p1 = scmp.ne.s32.totalorder %s579_s13, %s575_s12  ;;  %s591_s16 = sphi %s622_s16, %s13_s16   ;;  %s587_s15 = sphi %s620_s15, %s693_s15   ;;  %s583_s14 = sphi %s618_s14, %s692_s14   ;;  %s579_s13 = sphi %s616_s13, %s691_s13   ;;  %s575_s12 = sphi %s614_s12, %s690_s12  }
   0x4   : > { %p27_p0 = scmp.ge.s32.totalorder %s25_s17, 2  ;;  %p63_p2 = scmp.eq.s32.totalorder %s591_s16, 0 }
   0x5   : > { %s55_s19 = sadd.s32 1, %s579_s13  ;;  %p473_p5 = scmp.ge.s32.totalorder %s591_s16, 2 }
   0x6   : > { %s695_s17 = smov (%p27_p0, %s25_s17), 0  ;;  %p64_p3 = por %p63_p2, %p62_p1 }
   0x7   : > { %s52_s18 = ssub.s32 %s587_s15, %s695_s17  ;;  %143 = sbr.rel (%p473_p5) target bundleno = 23 (0x17), region = 24 }
   0x8   : > { %p53_p4 = scmp.eq.s32.totalorder %s52_s18, 0 }
   0xa   : > { %s649_s20 = scalar_select %p53_p4, %s579_s13, %s55_s19  }
   0xe   : > { %146 = sbr.rel (!%p64_p3) target bundleno = 23 (0x17), region = 28  ;;  %s148_s21 = sand.u32 (%p64_p3), 1, %s579_s13  }
   0xf   : > { %s493_s22 = sshll.u32 (%p64_p3), %s587_s15, 3  ;;  %s495_s23 = smul.u32 (%p64_p3), 72, %s148_s21 }
  0x10   : > { %s154_s26 = scalar_lea.vmem (%p64_p3), %s687_s1, %s493_s22 }
  0x11   : > { %v198_v0 = vld [vmem:[%s154_s26] sm:$0xff] (%p64_p3)  ;;  %v200_v1 = vld [vmem:[%s154_s26 + $0x10] sm:$0xff] (%p64_p3)  ;;  %s150_s27 = scalar_lea.vmem (%p64_p3), [#allocation2], %s495_s23 }
  0x12   : > { %v202_v2 = vld [vmem:[%s154_s26 + $0x20] sm:$0xff] (%p64_p3)  ;;  %v204_v3 = vld [vmem:[%s154_s26 + $0x30] sm:$0xff] (%p64_p3)  ;;  %199 = vst [vmem:[%s150_s27] sm:$0xff] (%p64_p3), %v198_v0  ;;  %201 = vst [vmem:[%s150_s27 + $0x8] sm:$0xff] (%p64_p3), %v200_v1 }
  0x13   : > { %v206_v4 = vld [vmem:[%s154_s26 + $0x40] sm:$0xff] (%p64_p3)  ;;  %v208_v5 = vld [vmem:[%s154_s26 + $0x50] sm:$0xff] (%p64_p3)  ;;  %203 = vst [vmem:[%s150_s27 + $0x10] sm:$0xff] (%p64_p3), %v202_v2  ;;  %205 = vst [vmem:[%s150_s27 + $0x18] sm:$0xff] (%p64_p3), %v204_v3 }
  0x14   : > { %207 = vst [vmem:[%s150_s27 + $0x20] sm:$0xff] (%p64_p3), %v206_v4  ;;  %209 = vst [vmem:[%s150_s27 + $0x28] sm:$0xff] (%p64_p3), %v208_v5  ;;  %v210_v6 = vld [vmem:[%s154_s26 + $0x60] sm:$0xff] (%p64_p3)  ;;  %v212_v7 = vld [vmem:[%s154_s26 + $0x70] sm:$0xff] (%p64_p3) }
  0x15   : > { %v214_v8 = vld [vmem:[%s154_s26 + $0x80] sm:$0xff]  ;;  %211 = vst [vmem:[%s150_s27 + $0x30] sm:$0xff] %v210_v6  ;;  %213 = vst [vmem:[%s150_s27 + $0x38] sm:$0xff] %v212_v7 }
  0x16   : > { %215 = vst [vmem:[%s150_s27 + $0x40] sm:$0xff] %v214_v8 }
  0x17 PF: > { %p476_p6 = scmp.ge.s32.totalorder %s591_s16, 1  ;;  %p220_p7 = scmp.lt.s32.totalorder %s591_s16, 3 }
  0x19   : > { %p221_p8 = pnand %p476_p6, %p220_p7 }
  0x1a   : > { %s227_s28 = sand.u32 (!%p221_p8), 1, %s575_s12   ;;  %v593_v9 = vmov (!%p221_p8), 0   ;;  %v277_v10 = vld [vmem:[%s688_s2] sm:$0xff] (!%p221_p8)  ;;  %vm332_vm0 = vcmask (!%p221_p8), 1043456   ;;  %vm328_vm1 = vcmask (!%p221_p8), 588800   ;;  %p257_p9 = scmp.lt.s32.totalorder (!%p221_p8), %s583_s14, 1 }
  0x1b   : > { %224 = sbr.rel (%p221_p8) target bundleno = 268 (0x10c), region = 66  ;;  %371 = vmatprep.mubr.bf16.mxu0 (!%p221_p8), %v593_v9  ;;  %538 = vset.pattern.permute.xlu0 (!%p221_p8), %v593_v9  ;;  %v267_v23 = vld [vmem:[%s686_s0] sm:$0xf] (!%p221_p8) }
  0x1c   : > { %s496_s29 = smul.u32 (!%p221_p8), 72, %s227_s28  ;;  %280 = vperm.xlu0 (!%p221_p8), %538, %v277_v10  }
  0x1e   : > { %s229_s5 = scalar_lea.vmem (!%p221_p8), [#allocation2], %s496_s29 }
  0x1f   : > { %v539_v11 = vld [vmem:[%s229_s5 + $0x4] ss:$8 sps:$4 sm:$0xff] (!%p221_p8)   ;;  %v541_v12 = vld [vmem:[%s229_s5] ss:$8 sps:$4 sm:$0xff] (!%p221_p8)   ;;  %v542_v13 = vld [vmem:[%s229_s5 + $0x14] ss:$8 sps:$4 sm:$0xff] (!%p221_p8)  }
  0x20   : > { %339 = vmatprep.subr.bf16.mxu0 (!%p221_p8), %v539_v11  ;;  %v544_v14 = vld [vmem:[%s229_s5 + $0x10] ss:$8 sps:$4 sm:$0xff] (!%p221_p8)   ;;  %v545_v15 = vld [vmem:[%s229_s5 + $0x24] ss:$8 sps:$4 sm:$0xff] (!%p221_p8)   ;;  %v547_v16 = vld [vmem:[%s229_s5 + $0x20] ss:$8 sps:$4 sm:$0xff] (!%p221_p8)  }
  0x21   : > { %340 = vmatpush1.bf16.msra.mxu0 (!%p221_p8), %v541_v12  ;;  %v548_v17 = vld [vmem:[%s229_s5 + $0x34] ss:$8 sps:$4 sm:$0xff] (!%p221_p8)   ;;  %v276_v18 = vld [vmem:[%s229_s5 + $0x40] sm:$0xff] (!%p221_p8)  ;;  %v550_v19 = vld [vmem:[%s229_s5 + $0x30] ss:$8 sps:$4 sm:$0xff] (!%p221_p8)  }
  0x22   : > { %341 = vmatprep.subr.bf16.mxu0 %v542_v13  ;;  %v488_v20 = vcombine.high %v276_v18, %v276_v18  ;;  %v487_v21 = vcombine.low %v276_v18, %v276_v18  ;;  %s697_s14 = smov (!%p257_p9, %s583_s14), 1 }
  0x23   : > { %s494_s8 = sshll.u32 %s697_s14, 4 }
  0x24   : > { %v334_v22 = vsel %vm332_vm0, %v487_v21, 0  ;;  %s264_s11 = scalar_lea.vmem %s689_s3, %s494_s8 }
  0x25   : > { %342 = vmatpush1.bf16.msra.mxu0 %v544_v14 }
  0x26   : > { %343 = vmatprep.subr.bf16.mxu0 %v545_v15 }
  0x29   : > { %344 = vmatpush1.bf16.msra.mxu0 %v547_v16 }
  0x2a   : > { %345 = vmatprep.subr.bf16.mxu0 %v548_v17 }
  0x2d   : > { %346 = vmatpush1.bf16.msra.mxu0 %v550_v19 }
  0x2e   : > { %489 = vmatprep.subr.msk.bf16.mxu0 %vm332_vm0, %v488_v20 }
  0x31   : > { %348 = vmatpush1.bf16.msra.mxu0 %v334_v22 }
  0x34   : > { %490 = vmatmul.mubr.msk.bf16.vlgmr.msra.gmra.mrb[0].mxu0 %vm328_vm1, %v267_v23 }
  0x9b   : > { %v281_v24 = vpop.permute.xlu0 %280 }
 0x107   : > { %v373_v25 = vpop.f32.mrb[0].mxu0 }
 0x108   : > { %v374_v26 = vadd.f32 %v373_v25, %v281_v24  ;;  %v375_v27 = vpop.f32.mrb[1].mxu0 }
 0x109   : > { %v376_v28 = vadd.f32 %v375_v27, %v281_v24  ;;  %v377_v29 = vpop.f32.mrb[2].mxu0 }
 0x10a   : > { %380 = vst [vmem:[%s264_s11] sm:$0xff] %v374_v26  ;;  %v378_v30 = vpop.f32.mrb[3].mxu0 }
 0x10b   : > { %381 = vst [vmem:[%s264_s11 + $0x8] sm:$0xff] %v376_v28 }
 0x10c PF: > { %s13_s16 = sadd.s32 1, %s591_s16   ;;  %s690_s12 = smov %s579_s13 }
 0x10d   : > { %p10_p10 = scmp.ge.s32.totalorder %s13_s16, 4   ;;  %s691_s13 = smov %s649_s20 }
 0x10e   : > { %s692_s14 = smov %s587_s15  ;;  %s693_s15 = smov %s695_s17 }
 0x10f   :  { %12 = sbr.rel (!%p10_p10) target bundleno = 3 (0x3), region = 105 }

// kernel: grouped_conv2d_pallas.1
= control target key start
LH: loop header
LB: loop body
LE: loop exit
PB: predicated region body
PF: predicated region fallthrough
CT: control target
= control target key end

     0   :  { %s614_s12 = smov 0   ;;  %s616_s13 = smov 0   ;;  %s686_s0 = inlined_call_operand.vmem [shape: bf16[8,72], index: 0, kind: input, shape index: {}]   ;;  %s687_s1 = inlined_call_operand.vmem [shape: bf16[72,512], index: 1, kind: input, shape index: {}]   ;;  %s688_s2 = inlined_call_operand.vmem [shape: f32[8,1], index: 2, kind: input, shape index: {}]   ;;  %s689_s3 = inlined_call_operand.vmem [shape: f32[2,8,256], index: 3, kind: output, shape index: {}]  }
   0x1   :  { %s618_s14 = smov 0   ;;  %s620_s15 = smov 0  }
   0x2   :  { %s622_s16 = smov 0  }
   0x3 LB: > { %s25_s17 = sadd.s32 1, %s587_s15  ;;  %p62_p1 = scmp.ne.s32.totalorder %s579_s13, %s575_s12  ;;  %s591_s16 = sphi %s622_s16, %s13_s16   ;;  %s587_s15 = sphi %s620_s15, %s693_s15   ;;  %s583_s14 = sphi %s618_s14, %s692_s14   ;;  %s579_s13 = sphi %s616_s13, %s691_s13   ;;  %s575_s12 = sphi %s614_s12, %s690_s12  }
   0x4   : > { %p27_p0 = scmp.ge.s32.totalorder %s25_s17, 2  ;;  %p63_p2 = scmp.eq.s32.totalorder %s591_s16, 0 }
   0x5   : > { %s55_s19 = sadd.s32 1, %s579_s13  ;;  %p473_p5 = scmp.ge.s32.totalorder %s591_s16, 2 }
   0x6   : > { %s695_s17 = smov (%p27_p0, %s25_s17), 0  ;;  %p64_p3 = por %p63_p2, %p62_p1 }
   0x7   : > { %s52_s18 = ssub.s32 %s587_s15, %s695_s17  ;;  %143 = sbr.rel (%p473_p5) target bundleno = 23 (0x17), region = 24 }
   0x8   : > { %p53_p4 = scmp.eq.s32.totalorder %s52_s18, 0 }
   0xa   : > { %s649_s20 = scalar_select %p53_p4, %s579_s13, %s55_s19  }
   0xe   : > { %146 = sbr.rel (!%p64_p3) target bundleno = 23 (0x17), region = 28  ;;  %s148_s21 = sand.u32 (%p64_p3), 1, %s579_s13  }
   0xf   : > { %s493_s22 = sshll.u32 (%p64_p3), %s587_s15, 3  ;;  %s495_s23 = smul.u32 (%p64_p3), 72, %s148_s21 }
  0x10   : > { %s154_s26 = scalar_lea.vmem (%p64_p3), %s687_s1, %s493_s22 }
  0x11   : > { %v198_v0 = vld [vmem:[%s154_s26] sm:$0xff] (%p64_p3)  ;;  %v200_v1 = vld [vmem:[%s154_s26 + $0x10] sm:$0xff] (%p64_p3)  ;;  %s150_s27 = scalar_lea.vmem (%p64_p3), [#allocation2], %s495_s23 }
  0x12   : > { %v202_v2 = vld [vmem:[%s154_s26 + $0x20] sm:$0xff] (%p64_p3)  ;;  %v204_v3 = vld [vmem:[%s154_s26 + $0x30] sm:$0xff] (%p64_p3)  ;;  %199 = vst [vmem:[%s150_s27] sm:$0xff] (%p64_p3), %v198_v0  ;;  %201 = vst [vmem:[%s150_s27 + $0x8] sm:$0xff] (%p64_p3), %v200_v1 }
  0x13   : > { %v206_v4 = vld [vmem:[%s154_s26 + $0x40] sm:$0xff] (%p64_p3)  ;;  %v208_v5 = vld [vmem:[%s154_s26 + $0x50] sm:$0xff] (%p64_p3)  ;;  %203 = vst [vmem:[%s150_s27 + $0x10] sm:$0xff] (%p64_p3), %v202_v2  ;;  %205 = vst [vmem:[%s150_s27 + $0x18] sm:$0xff] (%p64_p3), %v204_v3 }
  0x14   : > { %207 = vst [vmem:[%s150_s27 + $0x20] sm:$0xff] (%p64_p3), %v206_v4  ;;  %209 = vst [vmem:[%s150_s27 + $0x28] sm:$0xff] (%p64_p3), %v208_v5  ;;  %v210_v6 = vld [vmem:[%s154_s26 + $0x60] sm:$0xff] (%p64_p3)  ;;  %v212_v7 = vld [vmem:[%s154_s26 + $0x70] sm:$0xff] (%p64_p3) }
  0x15   : > { %v214_v8 = vld [vmem:[%s154_s26 + $0x80] sm:$0xff]  ;;  %211 = vst [vmem:[%s150_s27 + $0x30] sm:$0xff] %v210_v6  ;;  %213 = vst [vmem:[%s150_s27 + $0x38] sm:$0xff] %v212_v7 }
  0x16   : > { %215 = vst [vmem:[%s150_s27 + $0x40] sm:$0xff] %v214_v8 }
  0x17 PF: > { %p476_p6 = scmp.ge.s32.totalorder %s591_s16, 1  ;;  %p220_p7 = scmp.lt.s32.totalorder %s591_s16, 3 }
  0x19   : > { %p221_p8 = pnand %p476_p6, %p220_p7 }
  0x1a   : > { %s227_s28 = sand.u32 (!%p221_p8), 1, %s575_s12   ;;  %v593_v9 = vmov (!%p221_p8), 0   ;;  %v277_v10 = vld [vmem:[%s688_s2] sm:$0xff] (!%p221_p8)  ;;  %vm332_vm0 = vcmask (!%p221_p8), 1043456   ;;  %vm328_vm1 = vcmask (!%p221_p8), 588800   ;;  %p257_p9 = scmp.lt.s32.totalorder (!%p221_p8), %s583_s14, 1 }
  0x1b   : > { %224 = sbr.rel (%p221_p8) target bundleno = 268 (0x10c), region = 66  ;;  %371 = vmatprep.mubr.bf16.mxu0 (!%p221_p8), %v593_v9  ;;  %538 = vset.pattern.permute.xlu0 (!%p221_p8), %v593_v9  ;;  %v267_v23 = vld [vmem:[%s686_s0] sm:$0xf] (!%p221_p8) }
  0x1c   : > { %s496_s29 = smul.u32 (!%p221_p8), 72, %s227_s28  ;;  %280 = vperm.xlu0 (!%p221_p8), %538, %v277_v10  }
  0x1e   : > { %s229_s5 = scalar_lea.vmem (!%p221_p8), [#allocation2], %s496_s29 }
  0x1f   : > { %v539_v11 = vld [vmem:[%s229_s5 + $0x4] ss:$8 sps:$4 sm:$0xff] (!%p221_p8)   ;;  %v541_v12 = vld [vmem:[%s229_s5] ss:$8 sps:$4 sm:$0xff] (!%p221_p8)   ;;  %v542_v13 = vld [vmem:[%s229_s5 + $0x14] ss:$8 sps:$4 sm:$0xff] (!%p221_p8)  }
  0x20   : > { %339 = vmatprep.subr.bf16.mxu0 (!%p221_p8), %v539_v11  ;;  %v544_v14 = vld [vmem:[%s229_s5 + $0x10] ss:$8 sps:$4 sm:$0xff] (!%p221_p8)   ;;  %v545_v15 = vld [vmem:[%s229_s5 + $0x24] ss:$8 sps:$4 sm:$0xff] (!%p221_p8)   ;;  %v547_v16 = vld [vmem:[%s229_s5 + $0x20] ss:$8 sps:$4 sm:$0xff] (!%p221_p8)  }
  0x21   : > { %340 = vmatpush1.bf16.msra.mxu0 (!%p221_p8), %v541_v12  ;;  %v548_v17 = vld [vmem:[%s229_s5 + $0x34] ss:$8 sps:$4 sm:$0xff] (!%p221_p8)   ;;  %v276_v18 = vld [vmem:[%s229_s5 + $0x40] sm:$0xff] (!%p221_p8)  ;;  %v550_v19 = vld [vmem:[%s229_s5 + $0x30] ss:$8 sps:$4 sm:$0xff] (!%p221_p8)  }
  0x22   : > { %341 = vmatprep.subr.bf16.mxu0 %v542_v13  ;;  %v488_v20 = vcombine.high %v276_v18, %v276_v18  ;;  %v487_v21 = vcombine.low %v276_v18, %v276_v18  ;;  %s697_s14 = smov (!%p257_p9, %s583_s14), 1 }
  0x23   : > { %s494_s8 = sshll.u32 %s697_s14, 4 }
  0x24   : > { %v334_v22 = vsel %vm332_vm0, %v487_v21, 0  ;;  %s264_s11 = scalar_lea.vmem %s689_s3, %s494_s8 }
  0x25   : > { %342 = vmatpush1.bf16.msra.mxu0 %v544_v14 }
  0x26   : > { %343 = vmatprep.subr.bf16.mxu0 %v545_v15 }
  0x29   : > { %344 = vmatpush1.bf16.msra.mxu0 %v547_v16 }
  0x2a   : > { %345 = vmatprep.subr.bf16.mxu0 %v548_v17 }
  0x2d   : > { %346 = vmatpush1.bf16.msra.mxu0 %v550_v19 }
  0x2e   : > { %489 = vmatprep.subr.msk.bf16.mxu0 %vm332_vm0, %v488_v20 }
  0x31   : > { %348 = vmatpush1.bf16.msra.mxu0 %v334_v22 }
  0x34   : > { %490 = vmatmul.mubr.msk.bf16.vlgmr.msra.gmra.mrb[0].mxu0 %vm328_vm1, %v267_v23 }
  0x9b   : > { %v281_v24 = vpop.permute.xlu0 %280 }
 0x107   : > { %v373_v25 = vpop.f32.mrb[0].mxu0 }
 0x108   : > { %v374_v26 = vadd.f32 %v373_v25, %v281_v24  ;;  %v375_v27 = vpop.f32.mrb[1].mxu0 }
 0x109   : > { %v376_v28 = vadd.f32 %v375_v27, %v281_v24  ;;  %v377_v29 = vpop.f32.mrb[2].mxu0 }
 0x10a   : > { %380 = vst [vmem:[%s264_s11] sm:$0xff] %v374_v26  ;;  %v378_v30 = vpop.f32.mrb[3].mxu0 }
 0x10b   : > { %381 = vst [vmem:[%s264_s11 + $0x8] sm:$0xff] %v376_v28 }
 0x10c PF: > { %s13_s16 = sadd.s32 1, %s591_s16   ;;  %s690_s12 = smov %s579_s13 }
 0x10d   : > { %p10_p10 = scmp.ge.s32.totalorder %s13_s16, 4   ;;  %s691_s13 = smov %s649_s20 }
 0x10e   : > { %s692_s14 = smov %s587_s15  ;;  %s693_s15 = smov %s695_s17 }
 0x10f   :  { %12 = sbr.rel (!%p10_p10) target bundleno = 3 (0x3), region = 105 }

</bundles_post_ra>
